<compile_context>
chip_gen: v7x
topology: tpu7x:2x2x1
jax: 0.10.0
libtpu: 0.0.40
codegen_flags: <defaults>
</compile_context>

<pallas_src>
import jax
import jax.numpy as jnp
import numpy as np
from jax.experimental import pallas as pl
from jax.experimental.pallas import tpu as pltpu


def _gin_kernel(a_ref, x_ref, w1_ref, b1_ref, w2_ref, b2_ref, out_ref):
    # a_ref : (tile_n, P_pad) bf16  per-graph adjacency rows, (1+eps)*I folded in
    # x_ref : (P_pad, D_in)   f32   node features of this graph
    # w1    : (D_in, H)  b1 : (1, H)  w2 : (H, H)  b2 : (1, H)
    # out   : (tile_n, H)
    # Pure MXU chain: aggregate (incl. self term) + 2-layer MLP + both ReLUs.
    agg = jnp.dot(a_ref[...].astype(jnp.float32), x_ref[...],
                  preferred_element_type=jnp.float32)
    h1 = jnp.dot(agg, w1_ref[...], preferred_element_type=jnp.float32)
    h1 = jnp.maximum(h1 + b1_ref[...], 0.0)
    h2 = jnp.dot(h1, w2_ref[...], preferred_element_type=jnp.float32)
    h2 = jnp.maximum(h2 + b2_ref[...], 0.0)
    # NOTE: h=32 -> stores are masked (lane dim < 128); low priority while the
    # kernel is A-bandwidth-bound.
    out_ref[...] = h2.astype(out_ref.dtype)


def build_block_adjacency(src_idx, dst_idx, batch_size, nodes_per_graph, p_pad,
                          eps=0.0):
    """Per-graph dense adjacency blocks A'[g, v, u] with (1+eps)*I folded in.

    Build once and reuse across GIN layers/steps (the scatter + O(B*P^2)
    materialization is the expensive host-side part).
    """
    g = dst_idx // nodes_per_graph          # edges never cross graphs
    u = src_idx % nodes_per_graph
    v = dst_idx % nodes_per_graph
    adj = jnp.zeros((batch_size, p_pad, p_pad), jnp.float32)
    adj = adj.at[g, v, u].add(1.0)          # multi-edges counted (DGL 'sum')
    diag = jnp.arange(nodes_per_graph)
    adj = adj.at[:, diag, diag].add(1.0 + eps)   # self term folded into A
    # Small integer counts (+1) are exact in bf16 -> halves the A HBM stream
    # with bit-identical results after the in-kernel cast back to f32.
    return adj.astype(jnp.bfloat16)


def protein_gin_pallas(node_feats, src_idx, dst_idx, params, batch_size,
                       *, eps=0.0, tile_n=None, vmem_budget_bytes=48 << 20):
    """node_feats: (N, in_feats); src_idx/dst_idx: (E,) int32 edge endpoints.

    The batched graph is block-diagonal with equal-sized graphs (implied by
    the original `.view(batch_size, -1, hidden_feats)`).
    """
    n, d_in = node_feats.shape
    h = params["w1"].shape[1]
    assert n % batch_size == 0, "equal-sized graphs expected (view implies it)"
    p = n // batch_size                      # nodes per graph

    # ---- tile selection under an explicit VMEM budget (v7x-safe) ----------
    def est_bytes(tn, pp):
        a = 2 * tn * pp * 2                  # A tile, bf16, double-buffered
        x = 2 * pp * d_in * 4                # per-graph X slab, f32, dbl-buf
        o = 2 * tn * h * 4                   # output tile, f32, dbl-buf
        w = 2 * (d_in * h + h * h + 2 * h) * 4
        return a + x + o + w

    if tile_n is None:
        tile_n = min(512, ((p + 7) // 8) * 8)
    tile_n = max(8, (tile_n // 8) * 8)
    while True:
        p_pad = ((p + tile_n - 1) // tile_n) * tile_n
        if est_bytes(tile_n, p_pad) <= vmem_budget_bytes or tile_n == 8:
            break
        tile_n = max(8, ((tile_n // 2) // 8) * 8)
    # TODO(synk): for single very large graphs (P_pad in the tens of
    # thousands) add a contraction-axis grid dim + f32 accumulator (or a
    # CSR/scalar-prefetch gather path) instead of a resident per-graph X slab.

    pad = p_pad - p
    x = node_feats.astype(jnp.float32).reshape(batch_size, p, d_in)
    if pad:
        # Padded rows of A are zero -> padded outputs are relu(bias) garbage,
        # sliced off below.
        x = jnp.pad(x, ((0, 0), (0, pad), (0, 0)))

    adj = build_block_adjacency(src_idx, dst_idx, batch_size, p, p_pad, eps)

    w1 = params["w1"].astype(jnp.float32)
    b1 = params["b1"].reshape(1, h).astype(jnp.float32)
    w2 = params["w2"].astype(jnp.float32)
    b2 = params["b2"].reshape(1, h).astype(jnp.float32)

    grid = (batch_size, p_pad // tile_n)     # >= 2 steps for batch >= 2

    vmem_limit = int(min(max(2 * est_bytes(tile_n, p_pad), 32 << 20),
                         vmem_budget_bytes))

    out = pl.pallas_call(
        _gin_kernel,
        out_shape=jax.ShapeDtypeStruct((batch_size, p_pad, h), jnp.float32),
        grid=grid,
        in_specs=[
            # g-th graph's adjacency block, i-th row tile
            pl.BlockSpec((None, tile_n, p_pad), lambda g, i: (g, i, 0)),
            # g-th graph's full node-feature slab (resident across row tiles)
            pl.BlockSpec((None, p_pad, d_in), lambda g, i: (g, 0, 0)),
            pl.BlockSpec((d_in, h), lambda g, i: (0, 0)),   # w1
            pl.BlockSpec((1, h), lambda g, i: (0, 0)),      # b1
            pl.BlockSpec((h, h), lambda g, i: (0, 0)),      # w2
            pl.BlockSpec((1, h), lambda g, i: (0, 0)),      # b2
        ],
        out_specs=pl.BlockSpec((None, tile_n, h), lambda g, i: (g, i, 0)),
        compiler_params=pltpu.CompilerParams(
            dimension_semantics=("parallel", "parallel"),
            vmem_limit_bytes=vmem_limit),
    )(adj, x, w1, b1, w2, b2)

    return out[:, :p, :]                     # (batch_size, nodes_per_graph, H)


def protein_gin_ref(node_feats, src_idx, dst_idx, params, batch_size, eps=0.0):
    """Plain-JAX reference of the PyTorch/DGL forward."""
    n, _ = node_feats.shape
    h = params["w1"].shape[1]
    x = node_feats.astype(jnp.float32)
    neigh = jnp.zeros_like(x).at[dst_idx].add(x[src_idx])
    agg = (1.0 + eps) * x + neigh
    h1 = jnp.maximum(agg @ params["w1"] + params["b1"], 0.0)
    h2 = jnp.maximum(h1 @ params["w2"] + params["b2"], 0.0)
    return h2.reshape(batch_size, -1, h)


def init_params(key, in_feats, hidden_feats):
    # Mirrors nn.Linear default init (uniform +-1/sqrt(fan_in)); weights are
    # stored as (in, out) so the kernel computes x @ W directly.
    k1, k2, k3, k4 = jax.random.split(key, 4)
    lim1 = 1.0 / np.sqrt(in_feats)
    lim2 = 1.0 / np.sqrt(hidden_feats)
    return {
        "w1": jax.random.uniform(k1, (in_feats, hidden_feats), jnp.float32,
                                 -lim1, lim1),
        "b1": jax.random.uniform(k2, (hidden_feats,), jnp.float32, -lim1, lim1),
        "w2": jax.random.uniform(k3, (hidden_feats, hidden_feats), jnp.float32,
                                 -lim2, lim2),
        "b2": jax.random.uniform(k4, (hidden_feats,), jnp.float32, -lim2, lim2),
    }


if __name__ == "__main__":
    key = jax.random.PRNGKey(0)
    kx, ke, kp = jax.random.split(key, 3)

    in_feats = 32
    hidden_feats = 32
    batch_size = 2
    nodes_per_graph = 8            # node_feats: (16, 32) -> out (2, 8, 32)
    n_nodes = batch_size * nodes_per_graph
    n_edges = 40

    node_feats = jax.random.normal(kx, (n_nodes, in_feats), jnp.float32)

    # Batched graph = block-diagonal: every edge stays inside its own graph.
    kg, ku, kv = jax.random.split(ke, 3)
    g = jax.random.randint(kg, (n_edges,), 0, batch_size, jnp.int32)
    u = jax.random.randint(ku, (n_edges,), 0, nodes_per_graph, jnp.int32)
    v = jax.random.randint(kv, (n_edges,), 0, nodes_per_graph, jnp.int32)
    src_idx = g * nodes_per_graph + u
    dst_idx = g * nodes_per_graph + v

    params = init_params(kp, in_feats, hidden_feats)

    out = protein_gin_pallas(node_feats, src_idx, dst_idx, params, batch_size)
    out = jax.block_until_ready(out)

    ref = jax.block_until_ready(
        protein_gin_ref(node_feats, src_idx, dst_idx, params, batch_size))
    np.testing.assert_allclose(np.asarray(out), np.asarray(ref),
                               rtol=1e-4, atol=1e-4)

    print("KERNEL_OK")
</pallas_src>

<mosaic_0001>
module attributes {stable_mosaic.version = 11 : i64} {
  func.func @_gin_kernel(%arg0: i32, %arg1: i32, %arg2: memref<1x8x8xbf16, #tpu.memory_space<vmem>>, %arg3: memref<1x8x32xf32, #tpu.memory_space<vmem>>, %arg4: memref<32x32xf32, #tpu.memory_space<vmem>>, %arg5: memref<1x32xf32, #tpu.memory_space<vmem>>, %arg6: memref<32x32xf32, #tpu.memory_space<vmem>>, %arg7: memref<1x32xf32, #tpu.memory_space<vmem>>, %arg8: memref<1x8x32xf32, #tpu.memory_space<vmem>>) attributes {dimension_semantics = [#tpu.dimension_semantics<parallel>, #tpu.dimension_semantics<parallel>], iteration_bounds = array<i64: 2, 1>, scalar_prefetch = 0 : i64, scratch_operands = 0 : i64, tpu.core_type = #tpu.core_type<tc>, window_params = [{transform_indices = @transform_0, window_bounds = array<i64: 1, 8, 8>}, {transform_indices = @transform_1, window_bounds = array<i64: 1, 8, 32>}, {pipeline_mode = #tpu.pipeline_mode<synchronous>, transform_indices = @transform_2, window_bounds = array<i64: 32, 32>}, {pipeline_mode = #tpu.pipeline_mode<synchronous>, transform_indices = @transform_3, window_bounds = array<i64: 1, 32>}, {pipeline_mode = #tpu.pipeline_mode<synchronous>, transform_indices = @transform_4, window_bounds = array<i64: 32, 32>}, {pipeline_mode = #tpu.pipeline_mode<synchronous>, transform_indices = @transform_5, window_bounds = array<i64: 1, 32>}, {transform_indices = @transform_6, window_bounds = array<i64: 1, 8, 32>}]} {
    %c0 = arith.constant 0 : index
    %c0_0 = arith.constant 0 : index
    %c0_1 = arith.constant 0 : index
    %0 = vector.load %arg2[%c0, %c0_0, %c0_1] : memref<1x8x8xbf16, #tpu.memory_space<vmem>>, vector<1x8x8xbf16>
    %1 = vector.shape_cast %0 : vector<1x8x8xbf16> to vector<8x8xbf16>
    %2 = arith.extf %1 : vector<8x8xbf16> to vector<8x8xf32>
    %c0_2 = arith.constant 0 : index
    %c0_3 = arith.constant 0 : index
    %c0_4 = arith.constant 0 : index
    %3 = vector.load %arg3[%c0_2, %c0_3, %c0_4] : memref<1x8x32xf32, #tpu.memory_space<vmem>>, vector<1x8x32xf32>
    %4 = vector.shape_cast %3 : vector<1x8x32xf32> to vector<8x32xf32>
    %cst = arith.constant dense<0.000000e+00> : vector<8x32xf32>
    %5 = tpu.matmul %2, %4, %cst {dimension_numbers = #tpu.dot_dimension_numbers<[1], [0], [0], [1], [0, 0, 1, 1], [], []>} : vector<8x8xf32>, vector<8x32xf32>, vector<8x32xf32> -> vector<8x32xf32>
    %c0_5 = arith.constant 0 : index
    %c0_6 = arith.constant 0 : index
    %6 = vector.load %arg4[%c0_5, %c0_6] : memref<32x32xf32, #tpu.memory_space<vmem>>, vector<32x32xf32>
    %cst_7 = arith.constant dense<0.000000e+00> : vector<8x32xf32>
    %7 = tpu.matmul %5, %6, %cst_7 {dimension_numbers = #tpu.dot_dimension_numbers<[1], [0], [0], [1], [0, 0, 1, 1], [], []>} : vector<8x32xf32>, vector<32x32xf32>, vector<8x32xf32> -> vector<8x32xf32>
    %c0_8 = arith.constant 0 : index
    %c0_9 = arith.constant 0 : index
    %8 = vector.load %arg5[%c0_8, %c0_9] : memref<1x32xf32, #tpu.memory_space<vmem>>, vector<1x32xf32>
    %9 = vector.broadcast %8 : vector<1x32xf32> to vector<8x32xf32>
    %10 = arith.addf %7, %9 : vector<8x32xf32>
    %cst_10 = arith.constant 0.000000e+00 : f32
    %11 = vector.broadcast %cst_10 : f32 to vector<8x32xf32>
    %12 = arith.maximumf %10, %11 : vector<8x32xf32>
    %c0_11 = arith.constant 0 : index
    %c0_12 = arith.constant 0 : index
    %13 = vector.load %arg6[%c0_11, %c0_12] : memref<32x32xf32, #tpu.memory_space<vmem>>, vector<32x32xf32>
    %cst_13 = arith.constant dense<0.000000e+00> : vector<8x32xf32>
    %14 = tpu.matmul %12, %13, %cst_13 {dimension_numbers = #tpu.dot_dimension_numbers<[1], [0], [0], [1], [0, 0, 1, 1], [], []>} : vector<8x32xf32>, vector<32x32xf32>, vector<8x32xf32> -> vector<8x32xf32>
    %c0_14 = arith.constant 0 : index
    %c0_15 = arith.constant 0 : index
    %15 = vector.load %arg7[%c0_14, %c0_15] : memref<1x32xf32, #tpu.memory_space<vmem>>, vector<1x32xf32>
    %16 = vector.broadcast %15 : vector<1x32xf32> to vector<8x32xf32>
    %17 = arith.addf %14, %16 : vector<8x32xf32>
    %cst_16 = arith.constant 0.000000e+00 : f32
    %18 = vector.broadcast %cst_16 : f32 to vector<8x32xf32>
    %19 = arith.maximumf %17, %18 : vector<8x32xf32>
    %c0_17 = arith.constant 0 : index
    %c0_18 = arith.constant 0 : index
    %c0_19 = arith.constant 0 : index
    %20 = vector.load %arg8[%c0_17, %c0_18, %c0_19] : memref<1x8x32xf32, #tpu.memory_space<vmem>>, vector<1x8x32xf32>
    %21 = vector.shape_cast %20 : vector<1x8x32xf32> to vector<8x32xf32>
    %22 = vector.shape_cast %19 : vector<8x32xf32> to vector<1x8x32xf32>
    tpu.vector_store %arg8[%c0_17, %c0_18, %c0_19], %22 {strides = array<i32>} : memref<1x8x32xf32, #tpu.memory_space<vmem>>, vector<1x8x32xf32>,
    return
  }
  func.func @transform_0(%arg0: i32, %arg1: i32) -> (i32, i32, i32) {
    %c0_i32 = arith.constant 0 : i32
    %c0_i32_0 = arith.constant 0 : i32
    return %arg0, %arg1, %c0_i32 : i32, i32, i32
  }
  func.func @transform_1(%arg0: i32, %arg1: i32) -> (i32, i32, i32) {
    %c0_i32 = arith.constant 0 : i32
    %c0_i32_0 = arith.constant 0 : i32
    %c0_i32_1 = arith.constant 0 : i32
    return %arg0, %c0_i32, %c0_i32_0 : i32, i32, i32
  }
  func.func @transform_2(%arg0: i32, %arg1: i32) -> (i32, i32) {
    %c0_i32 = arith.constant 0 : i32
    %c0_i32_0 = arith.constant 0 : i32
    %c0_i32_1 = arith.constant 0 : i32
    return %c0_i32, %c0_i32_0 : i32, i32
  }
  func.func @transform_3(%arg0: i32, %arg1: i32) -> (i32, i32) {
    %c0_i32 = arith.constant 0 : i32
    %c0_i32_0 = arith.constant 0 : i32
    %c0_i32_1 = arith.constant 0 : i32
    return %c0_i32, %c0_i32_0 : i32, i32
  }
  func.func @transform_4(%arg0: i32, %arg1: i32) -> (i32, i32) {
    %c0_i32 = arith.constant 0 : i32
    %c0_i32_0 = arith.constant 0 : i32
    %c0_i32_1 = arith.constant 0 : i32
    return %c0_i32, %c0_i32_0 : i32, i32
  }
  func.func @transform_5(%arg0: i32, %arg1: i32) -> (i32, i32) {
    %c0_i32 = arith.constant 0 : i32
    %c0_i32_0 = arith.constant 0 : i32
    %c0_i32_1 = arith.constant 0 : i32
    return %c0_i32, %c0_i32_0 : i32, i32
  }
  func.func @transform_6(%arg0: i32, %arg1: i32) -> (i32, i32, i32) {
    %c0_i32 = arith.constant 0 : i32
    %c0_i32_0 = arith.constant 0 : i32
    return %arg0, %arg1, %c0_i32 : i32, i32, i32
  }
}

</mosaic_0001>

<bundles_post_ra>
// kernel: tpu_custom_call.1
= control target key start
LH: loop header
LB: loop body
LE: loop exit
PB: predicated region body
PF: predicated region fallthrough
CT: control target
= control target key end

     0   :  { %s1467_s0 = inlined_call_operand.hbm [shape: bf16[2,8,8], index: 0, kind: input, shape index: {}]   ;;  %s1468_s1 = inlined_call_operand.hbm [shape: f32[2,8,32], index: 1, kind: input, shape index: {}]   ;;  %s1469_s2 = inlined_call_operand.hbm [shape: f32[32,32], index: 2, kind: input, shape index: {}]   ;;  %s1470_s3 = inlined_call_operand.vmem [shape: f32[1,32], index: 3, kind: input, shape index: {}]   ;;  %s1471_s4 = inlined_call_operand.hbm [shape: f32[32,32], index: 4, kind: input, shape index: {}]   ;;  %s1472_s5 = inlined_call_operand.vmem [shape: f32[1,32], index: 5, kind: input, shape index: {}]   ;;  %s1473_s6 = inlined_call_operand.hbm [shape: f32[2,8,32], index: 6, kind: output, shape index: {}]  }
   0x1   :  { %1479 = sst [smem:[#allocation17_spill]] %s1467_s0 }
   0x2   :  { %1480 = sst [smem:[#allocation18_spill]] %s1469_s2 }
   0x3   :  { %1481 = sst [smem:[#allocation19_spill]] %s1471_s4 }
   0x4   :  { %11 = vsyncpa [#allocation3], 0 }
   0x5   :  { %13 = vsyncpa [#allocation3 + $0x1], 0 }
   0x6   :  { %14 = vsyncpa [#allocation6], 0 }
   0x7   :  { %16 = vsyncpa [#allocation6 + $0x1], 0 }
   0x8   :  { %17 = vsyncpa [#allocation9], 0 }
   0x9   :  { %18 = vsyncpa [#allocation4], 0 }
   0xa   :  { %20 = vsyncpa [#allocation4 + $0x1], 0  ;;  %s1162_s21 = smov 0   ;;  %s1164_s22 = smov 0  }
   0xb   :  { %s1166_s23 = smov 0   ;;  %s1168_s24 = smov 0  }
   0xc   :  { %s1170_s25 = smov 0   ;;  %s1172_s26 = smov 0  }
   0xd LB: > { %s1193_s27 = sadd.s32 4294967295, %s1115_s26   ;;  %s737_s28 = sadd.s32 4294967294, %s1115_s26   ;;  %s1115_s26 = sphi %s1172_s26, %s26_s26   ;;  %s1111_s25 = sphi %s1170_s25, %s1508_s25   ;;  %s1107_s24 = sphi %s1168_s24, %s1507_s24   ;;  %s1103_s23 = sphi %s1166_s23, %s1506_s23   ;;  %s1099_s22 = sphi %s1164_s22, %s1505_s22   ;;  %s1095_s21 = sphi %s1162_s21, %s1504_s21  }
   0xe   : > { %p60_p0 = scmp.ne.s32.totalorder %s1099_s22, %s1095_s21  ;;  %p1474_p1 = scmp.eq.s32.totalorder %s1193_s27, 0 }
   0xf   : > { %p202_p3 = scmp.eq.s32.totalorder %s737_s28, 1  ;;  %p738_p5 = scmp.ge.s32.totalorder %s1115_s26, 1 }
  0x10   : > { %p1202_p4 = por %p1474_p1, %p60_p0  ;;  %p209_p7 = scmp.lt.s32.totalorder %s1115_s26, 3 }
  0x11   : > { %p1207_p6 = por %p202_p3, %p60_p0  ;;  %s1117_s8 = smov [#allocation7]  }
  0x12   : > { %s1482_s29 = scalar_select %p1202_p4, 1, 0 }
  0x13   : > { %s1483_s30 = scalar_select %p1207_p6, 1, 0 }
  0x14   : > { %p1212_p8 = pnand %p738_p5, %p209_p7  ;;  %s221_s9 = sshll.u32 %s1117_s8, 4  ;;  %s1216_s9 = int_to_ptr.vmem [resolvable:$true] %s221_s9 }
  0x15   : > { %s1118_s11 = smov [#allocation8]   ;;  %s1486_s2 = sld [smem:[#allocation18_spill]] }
  0x16   : > { %s1484_s7 = scalar_select %p1212_p8, 1, 0 }
  0x17   : > { %p826_p9 = pneg %p1212_p8  ;;  %s237_s12 = sshll.u32 %s1118_s11, 4  ;;  %s1227_s12 = int_to_ptr.vmem [resolvable:$true] %s237_s12 }
  0x19   : > { %p1223_p11 = pnand %p826_p9, %p1474_p1 }
  0x1b   : > { %s905_s15 = scalar_lea.hbm %s1486_s2, 512  ;;  %p907_p13 = pneg %p1223_p11 }
  0x1c   : > { %p906_p12 = scmp.ne.s32.totalorder %s1486_s2, %s905_s15  ;;  %p912_p5 = scmp.lt.u32.totalorder %s905_s15, %s1486_s2 }
  0x1e   : > { %p908_p0 = pnand %p907_p13, %p906_p12 }
  0x20   : > { %p909_p3 = pneg %p908_p0 }
  0x22   : > { %p914_p7 = pnand %p912_p5, %p909_p3 }
  0x24   : > { %917 = shalt.err (!%p914_p7)
}
  0x25   : > { %s918_s20 = scalar_lea.vmem %s1216_s9, 512  ;;  %p926_p2 = scmp.lt.s32.totalorder %s1216_s9, %s1216_s9 }
  0x26   : > { %p919_p9 = scmp.ne.s32.totalorder %s1216_s9, %s918_s20  ;;  %p927_p12 = scmp.lt.s32.totalorder %s918_s20, %s918_s20 }
  0x28   : > { %p921_p10 = pnand %p919_p9, %p907_p13  ;;  %p928_p0 = por %p927_p12, %p926_p2 }
  0x2a   : > { %p922_p1 = pneg %p921_p10 }
  0x2c   : > { %p929_p6 = pnand %p928_p0, %p922_p1 }
  0x2e   : > { %932 = shalt.err (!%p929_p6)
}
  0x2f   : > { %s1119_s28 = smov 128   ;;  %s1120_s8 = smov 8  }
  0x30   : > { %829 = dma.hbm_to_vmem [thread:$0]  (!%p1223_p11), %s1486_s2, 512, %s1216_s9, [#allocation6], %s1119_s28, %s1119_s28, %s1120_s8  }
  0x31   : > { %s1487_s4 = sld [smem:[#allocation19_spill]] }
  0x37   : > { %s933_s16 = scalar_lea.hbm %s1487_s4, 512 }
  0x38   : > { %p934_p2 = scmp.ne.s32.totalorder %s1487_s4, %s933_s16  ;;  %p940_p10 = scmp.lt.u32.totalorder %s933_s16, %s1487_s4 }
  0x3a   : > { %p936_p1 = pnand %p934_p2, %p907_p13 }
  0x3c   : > { %p937_p6 = pneg %p936_p1 }
  0x3e   : > { %p942_p3 = pnand %p940_p10, %p937_p6 }
  0x40   : > { %945 = shalt.err (!%p942_p3)
}
  0x41   : > { %s946_s9 = scalar_lea.vmem %s1227_s12, 512  ;;  %p954_p12 = scmp.lt.s32.totalorder %s1227_s12, %s1227_s12 }
  0x42   : > { %p947_p5 = scmp.ne.s32.totalorder %s1227_s12, %s946_s9  ;;  %p955_p0 = scmp.lt.s32.totalorder %s946_s9, %s946_s9 }
  0x44   : > { %p949_p7 = pnand %p947_p5, %p907_p13  ;;  %p956_p2 = por %p955_p0, %p954_p12 }
  0x46   : > { %p950_p9 = pneg %p949_p7 }
  0x48   : > { %p957_p1 = pnand %p956_p2, %p950_p9 }
  0x4a   : > { %960 = shalt.err (!%p957_p1)
}
  0x4b   : > { %832 = dma.hbm_to_vmem [thread:$0]  (!%p1223_p11), %s1487_s4, 512, %s1227_s12, [#allocation9], %s1119_s28, %s1119_s28, %s1120_s8  }
  0x4c   : > { %s38_s14 = sadd.s32 1, %s1111_s25  ;;  %s47_s15 = sadd.s32 1, %s1103_s23 }
  0x4d   : > { %p40_p13 = scmp.ge.s32.totalorder %s38_s14, 2  ;;  %p54_p6 = scmp.ne.s32.totalorder %s1103_s23, %s1099_s22 }
  0x4e   : > { %p55_p10 = scmp.eq.s32.totalorder %s1115_s26, 0  ;;  %p846_p3 = scmp.lt.s32.totalorder %s1115_s26, 2 }
  0x4f   : > { %s1510_s14 = smov (%p40_p13, %s38_s14), 0  ;;  %p1489_p7 = scmp.eq.s32.totalorder %s1193_s27, 1 }
  0x50   : > { %1488 = sst [smem:[#allocation16_spill]] %s1510_s14  ;;  %p56_p5 = por %p55_p10, %p54_p6 }
  0x51   : > { %p1291_p9 = por %p1489_p7, %p54_p6  ;;  %s42_s16 = ssub.s32 %s1111_s25, %s1510_s14 }
  0x52   : > { %s1298_s17 = sand.u32 1, %s1103_s23   ;;  %p45_p11 = scmp.eq.s32.totalorder %s42_s16, 0 }
  0x53   : > { %s1490_s10 = scalar_select %p1291_p9, 1, 0 }
  0x54   : > { %s742_s12 = sshll.u32 %s1298_s17, 2  ;;  %s743_s28 = sshll.u32 %s1111_s25, 6 }
  0x55   : > { %s1303_s8 = scalar_select %p45_p11, %s1103_s23, %s47_s15  }
  0x56   : > { %s1491_s0 = sld [smem:[#allocation17_spill]]  ;;  %s258_s9 = scalar_lea.vmem [#allocation2], %s742_s12 }
  0x57   : > { %s266_s11 = sshll.u32 %s258_s9, 4  ;;  %p1312_p12 = pnand %p846_p3, %p56_p5  ;;  %s1316_s11 = int_to_ptr.vmem [resolvable:$true] %s266_s11 }
  0x58   : > { %s255_s16 = scalar_lea.sflag [#allocation3], %s1298_s17 }
  0x59   : > { %p963_p2 = pneg %p1312_p12 }
  0x5c   : > { %s1308_s20 = scalar_lea.hbm %s1491_s0, %s743_s28  ;;  %s966_s19 = scalar_lea.hbm %s1491_s0, 128 }
  0x5d   : > { %s961_s18 = scalar_lea.hbm %s1308_s20, 64  ;;  %p967_p6 = scmp.lt.u32.totalorder %s1308_s20, %s1491_s0 }
  0x5e   : > { %p962_p0 = scmp.ne.s32.totalorder %s1308_s20, %s961_s18  ;;  %p968_p10 = scmp.lt.u32.totalorder %s966_s19, %s961_s18 }
  0x5f   : > { %p970_p5 = scmp.lt.u32.totalorder %s961_s18, %s1308_s20 }
  0x60   : > { %p964_p1 = pnand %p963_p2, %p962_p0  ;;  %p969_p3 = por %p968_p10, %p967_p6 }
  0x62   : > { %p965_p13 = pneg %p964_p1  ;;  %p971_p7 = por %p970_p5, %p969_p3 }
  0x64   : > { %p972_p11 = pnand %p971_p7, %p965_p13 }
  0x66   : > { %975 = shalt.err (!%p972_p11)
}
  0x67   : > { %s976_s15 = scalar_lea.vmem %s1316_s11, 64  ;;  %s1121_s12 = smov [#allocation2]  }
  0x68   : > { %p977_p0 = scmp.ne.s32.totalorder %s1316_s11, %s976_s15  ;;  %s981_s28 = sshll.u32 %s1121_s12, 4  ;;  %s982_s28 = int_to_ptr.vmem [resolvable:$false] %s981_s28 }
  0x69   : > { %s983_s2 = scalar_lea.vmem %s982_s28, 128  ;;  %p984_p4 = scmp.lt.s32.totalorder %s1316_s11, %s982_s28 }
  0x6a   : > { %p979_p1 = pnand %p977_p0, %p963_p2  ;;  %p985_p6 = scmp.lt.s32.totalorder %s983_s2, %s976_s15 }
  0x6c   : > { %p980_p9 = pneg %p979_p1  ;;  %p986_p10 = por %p985_p6, %p984_p4 }
  0x6e   : > { %p987_p3 = pnand %p986_p10, %p980_p9 }
  0x70   : > { %990 = shalt.err (!%p987_p3)
}
  0x71   : > { %836 = dma.hbm_to_vmem [thread:$0]  (!%p1312_p12), %s1308_s20, 64, %s1316_s11, %s255_s16  }
  0x72   : > { %s744_s18 = sshll.u32 %s1298_s17, 3  ;;  %s745_s19 = sshll.u32 %s1111_s25, 7 }
  0x73   : > { %s1350_s0 = scalar_lea.hbm %s1468_s1, %s745_s19  ;;  %s277_s15 = scalar_lea.vmem [#allocation5], %s744_s18 }
  0x74   : > { %s284_s28 = sshll.u32 %s277_s15, 4  ;;  %s1493_s2 = sand.u32 1, %s1115_s26   ;;  %s285_s28 = int_to_ptr.vmem [resolvable:$true] %s284_s28 }
  0x75   : > { %s274_s4 = scalar_lea.sflag [#allocation6], %s1493_s2  ;;  %s991_s14 = scalar_lea.hbm %s1350_s0, 128 }
  0x76   : > { %p992_p4 = scmp.ne.s32.totalorder %s1350_s0, %s991_s14  ;;  %s996_s11 = scalar_lea.hbm %s1468_s1, 256 }
  0x77   : > { %p997_p5 = scmp.lt.u32.totalorder %s1350_s0, %s1468_s1  ;;  %p998_p7 = scmp.lt.u32.totalorder %s996_s11, %s991_s14 }
  0x78   : > { %p994_p9 = pnand %p992_p4, %p963_p2  ;;  %p1000_p0 = scmp.lt.u32.totalorder %s991_s14, %s1350_s0 }
  0x79   : > { %p999_p11 = por %p998_p7, %p997_p5 }
  0x7a   : > { %p995_p13 = pneg %p994_p9 }
  0x7b   : > { %p1001_p1 = por %p1000_p0, %p999_p11 }
  0x7d   : > { %p1002_p6 = pnand %p1001_p1, %p995_p13 }
  0x7f   : > { %1005 = shalt.err (!%p1002_p6)
}
  0x80   : > { %s1006_s18 = scalar_lea.vmem %s285_s28, 128  ;;  %s1122_s9 = smov [#allocation5]  }
  0x81   : > { %p1007_p10 = scmp.ne.s32.totalorder %s285_s28, %s1006_s18  ;;  %s1011_s12 = sshll.u32 %s1122_s9, 4  ;;  %s1012_s12 = int_to_ptr.vmem [resolvable:$false] %s1011_s12 }
  0x82   : > { %s1013_s15 = scalar_lea.vmem %s1012_s12, 256  ;;  %p1014_p9 = scmp.lt.s32.totalorder %s285_s28, %s1012_s12 }
  0x83   : > { %p1009_p3 = pnand %p1007_p10, %p963_p2  ;;  %p1015_p8 = scmp.lt.s32.totalorder %s1013_s15, %s1006_s18 }
  0x85   : > { %p1010_p4 = pneg %p1009_p3  ;;  %p1016_p5 = por %p1015_p8, %p1014_p9 }
  0x87   : > { %p1017_p7 = pnand %p1016_p5, %p1010_p4 }
  0x89   : > { %1020 = shalt.err (!%p1017_p7)
}
  0x8a   : > { %839 = dma.hbm_to_vmem [thread:$0]  (!%p1312_p12), %s1350_s0, 128, %s285_s28, %s274_s4  }
  0x8b   : > { %p1494_p13 = scmp.ne.s32.totalorder %s1484_s7, 0 }
  0x8c   : > { %s1376_s14 = sand.u32 (!%p1494_p13), 1, %s1099_s22   ;;  %p1495_p2 = scmp.ne.s32.totalorder (!%p1494_p13), %s1482_s29, 0 }
  0x8d   : > { %293 = sbr.rel (%p1494_p13) target bundleno = 820 (0x334), region = 44  ;;  %s747_s2 = sshll.u32 (!%p1494_p13), %s1376_s14, 2 }
  0x8e   : > { %s296_s17 = scalar_lea.sflag (!%p1494_p13), [#allocation3], %s1376_s14  ;;  %s299_s20 = scalar_lea.vmem (!%p1494_p13), [#allocation2], %s747_s2 }
  0x94   : > { %1074 = dma.done.wait (%p1495_p2), %s296_s17, 64  }
  0x95   : > { %1076 = vsyncadd (%p1495_p2), %s296_s17, 4294967232  ;;  %s304_s0 = sand.u32 1, %s1193_s27   ;;  %s748_s4 = sshll.u32 %s1376_s14, 3 }
  0x96   : > { %s305_s7 = scalar_lea.sflag [#allocation6], %s304_s0  ;;  %s308_s13 = scalar_lea.vmem [#allocation5], %s748_s4 }
  0x97   : > { %1078 = dma.done.wait (%p1495_p2), %s305_s7, 128  }
  0x98   : > { %1080 = vsyncadd (%p1495_p2), %s305_s7, 4294967168  ;;  %p1496_p8 = scmp.eq.s32.totalorder %s1193_s27, 0 }
  0x9a   : > { %1082 = dma.done.wait (%p1496_p8), [#allocation6], 512   ;;  %p1497_p12 = pmov %p1496_p8 }
  0x9b   : > { %p1498_p11 = pmov %p1496_p8 }
  0x9c   : > { %1084 = vsyncadd (%p1497_p12), [#allocation6], 4294966784 }
  0x9d   : > { %1086 = dma.done.wait (%p1498_p11), [#allocation9], 512   ;;  %p1499_p0 = pmov %p1496_p8 }
  0x9e   : > { %v1123_v0 = vmov 0.0   ;;  %vm1124_vm0 = vmmov 0   ;;  %v1125_v1 = vmov 0.0|0.0   ;;  %v352_v2 = vld [vmem:[%s308_s13] sm:$0xff]  ;;  %v350_v3 = vld [vmem:[%s299_s20] sm:$0xf] }
  0x9f   : > { %1088 = vsyncadd (%p1499_p0), [#allocation9], 4294966784  ;;  %773 = vmatprep.subr.mxu0 %v1123_v0  ;;  %775 = vmatprep.mubr.msk.f32.mxu0 %vm1124_vm0, %v1123_v0  ;;  %vm353_vm1 = vcmask 64512   ;;  %v427_v4 = vld [vmem:[#allocation7] sm:$0xff]  ;;  %v351_v5 = vunpack.c.l.bf16 %v350_v3  ;;  %v428_v6 = vld [vmem:[#allocation7 + $0x8] sm:$0xff]  ;;  %vm438_vm2 = vcmask 261120  }
  0xa0   : > { %800 = vmatprep.subr.bf16.mxu1 %v1125_v1  ;;  %786 = vmatprep.mubr.msk.f32.mxu1 %vm1124_vm0, %v1123_v0  ;;  %v429_v7 = vld [vmem:[#allocation7 + $0x10] sm:$0xff]  ;;  %v430_v8 = vld [vmem:[#allocation7 + $0x18] sm:$0xff]  ;;  %v801_v9 = vpack.c.bf16 %v428_v6, %v427_v4  ;;  %v513_v11 = vld [vmem:[#allocation8] sm:$0xff]  ;;  %s758_s16 = sshll.u32 %s1107_s24, 7  ;;  %s349_s19 = scalar_lea.vmem [#allocation10], %s748_s4 }
  0xa1   : > { %774 = vmatpush3.msra.mxu0 %v352_v2  ;;  %v804_v10 = vpack.c.bf16 %v430_v8, %v429_v7  ;;  %v514_v12 = vld [vmem:[#allocation8 + $0x8] sm:$0xff]  ;;  %v515_v16 = vld [vmem:[#allocation8 + $0x10] sm:$0xff]  ;;  %v516_v17 = vld [vmem:[#allocation8 + $0x18] sm:$0xff]  ;;  %s614_s18 = sshll.u32 %s349_s19, 4  ;;  %s1417_s15 = scalar_lea.hbm %s1473_s6, %s758_s16  ;;  %s1419_s18 = int_to_ptr.vmem [resolvable:$true] %s614_s18 }
  0xa2   : > { %806 = vmatprep.subr.bf16.mxu0 %v1125_v1  ;;  %776 = vmatmul.mubr.msk.f32.vlgmr.msra.gmra.mrb[0].mxu0 %vm353_vm1, %v351_v5  ;;  %v807_v13 = vpack.c.bf16 %v514_v12, %v513_v11  ;;  %v810_v18 = vpack.c.bf16 %v516_v17, %v515_v16  ;;  %v753_v19 = vld [vmem:[%s1470_s3] ss:$0 sm:$0xff]  ;;  %s600_s2 = scalar_lea.sflag [#allocation4], %s1376_s14  ;;  %s1021_s24 = scalar_lea.vmem %s1419_s18, 128 }
  0xa3   : > { %802 = vmatpush3.bf16.msra.mxu1 %v801_v9  ;;  %797 = vmatprep.mubr.msk.f32.mxu0 %vm1124_vm0, %v1123_v0  ;;  %v755_v24 = vld [vmem:[%s1472_s5] ss:$0 sm:$0xff]  ;;  %p1022_p1 = scmp.ne.s32.totalorder %s1419_s18, %s1021_s24  ;;  %p1500_p6 = scmp.ne.s32.totalorder %s1490_s10, 0 }
  0xa4   : > { %803 = vmatprep.subr.bf16.mxu1 %v1125_v1  ;;  %808 = vmatpush3.bf16.msra.mxu0 %v807_v13  ;;  %s1126_s17 = smov [#allocation10]  }
  0xa5   : > { %809 = vmatprep.subr.bf16.mxu0 %v1125_v1  ;;  %p1023_p10 = pnand %p1022_p1, %p1500_p6  ;;  %s1025_s20 = sshll.u32 %s1126_s17, 4  ;;  %s1026_s20 = int_to_ptr.vmem [resolvable:$false] %s1025_s20 }
  0xa6   : > { %s1027_s0 = scalar_lea.vmem %s1026_s20, 256  ;;  %p1028_p4 = scmp.lt.s32.totalorder %s1419_s18, %s1026_s20 }
  0xa7   : > { %805 = vmatpush3.bf16.msra.mxu1 %v804_v10  ;;  %p1024_p3 = pneg %p1023_p10  ;;  %p1029_p9 = scmp.lt.s32.totalorder %s1027_s0, %s1021_s24 }
  0xa8   : > { %811 = vmatpush3.bf16.msra.mxu0 %v810_v18 }
  0xa9   : > { %p1030_p5 = por %p1029_p9, %p1028_p4 }
  0xab   : > { %p1031_p7 = pnand %p1030_p5, %p1024_p3 }
 0x175   : > { %v423_v14 = vpop.f32.mrb[0].mxu0 }
 0x176   : > { %v777_v15 = vpop.f32.mrb[1].mxu0  ;;  %787 = vmatmul.mubr.msk.f32.vlgmr.msra.gmra.mrb[0].mxu1 %vm438_vm2, %v423_v14 }
 0x249   : > { %v508_v20 = vpop.f32.mrb[0].mxu1 }
 0x24a   : > { %v509_v21 = vadd.f32 %v753_v19, %v508_v20  ;;  %v788_v22 = vpop.f32.mrb[1].mxu1 }
 0x24c   : > { %v512_v23 = vmax.f32 %v509_v21, 0.0 }
 0x24e   : > { %798 = vmatmul.mubr.msk.f32.vlgmr.msra.gmra.mrb[2].mxu0 %vm438_vm2, %v512_v23 }
 0x321   : > { %v593_v25 = vpop.f32.mrb[2].mxu0 }
 0x322   : > { %v594_v26 = vadd.f32 %v755_v24, %v593_v25  ;;  %v799_v27 = vpop.f32.mrb[3].mxu0 }
 0x324   : > { %v597_v28 = vmax.f32 %v594_v26, 0.0 }
 0x326   : > { %598 = vst.msk [vmem:[%s349_s19] sm:$0xff] %vm438_vm2, %v597_v28 }
 0x327   : > { %1034 = shalt.err (!%p1031_p7)
}
 0x328   : > { %s1035_s14 = scalar_lea.hbm %s1417_s15, 128  ;;  %s1039_s13 = scalar_lea.hbm %s1473_s6, 256 }
 0x329   : > { %p1036_p13 = scmp.ne.s32.totalorder %s1417_s15, %s1035_s14  ;;  %p1040_p12 = scmp.lt.u32.totalorder %s1417_s15, %s1473_s6 }
 0x32a   : > { %p1041_p11 = scmp.lt.u32.totalorder %s1039_s13, %s1035_s14  ;;  %p1043_p1 = scmp.lt.u32.totalorder %s1035_s14, %s1417_s15 }
 0x32b   : > { %p1037_p2 = pnand %p1036_p13, %p1500_p6 }
 0x32c   : > { %p1042_p0 = por %p1041_p11, %p1040_p12 }
 0x32d   : > { %p1038_p8 = pneg %p1037_p2 }
 0x32e   : > { %p1044_p10 = por %p1043_p1, %p1042_p0 }
 0x330   : > { %p1045_p3 = pnand %p1044_p10, %p1038_p8 }
 0x332   : > { %1048 = shalt.err (!%p1045_p3)
}
 0x333   : > { %824 = dma.vmem_to_hbm [thread:$0]  (%p1500_p6), %s1419_s18, 128, %s1417_s15, %s600_s2  }
 0x334 PF: > { %s626_s28 = sand.u32 1, %s1095_s21   ;;  %p1501_p4 = scmp.ne.s32.totalorder %s1483_s30, 0 }
 0x335   : > { %p1502_p9 = scmp.ge.s32.totalorder %s1115_s26, 2  ;;  %s627_s11 = scalar_lea.sflag [#allocation4], %s626_s28 }
 0x337   : > { %p841_p5 = pnand %p1502_p9, %p1501_p4 }
 0x339   : > { %1090 = dma.done.wait (!%p841_p5), %s627_s11, 128  }
 0x33a   : > { %1092 = vsyncadd (!%p841_p5), %s627_s11, 4294967168  ;;  %s26_s26 = sadd.s32 1, %s1115_s26   ;;  %s1503_s10 = sld [smem:[#allocation16_spill]] }
 0x33b   : > { %p23_p7 = scmp.ge.s32.totalorder %s26_s26, 4   ;;  %s1504_s21 = smov %s1099_s22 }
 0x33c   : > { %s1505_s22 = smov %s1103_s23  ;;  %s1506_s23 = smov %s1303_s8 }
 0x33d   : > { %s1507_s24 = smov %s1111_s25  ;;  %25 = sbr.rel (!%p23_p7) target bundleno = 13 (0xd), region = 110 }
 0x340   : > { %s1508_s25 = smov %s1503_s10 }
 0x344   :  { %632 = vsyncpa [#allocation3], 1 }
 0x345   :  { %634 = vsyncpa [#allocation3 + $0x1], 1 }
 0x346   :  { %635 = vsyncpa [#allocation6], 1 }
 0x347   :  { %637 = vsyncpa [#allocation6 + $0x1], 1 }
 0x348   :  { %638 = vsyncpa [#allocation9], 1 }
 0x349   :  { %639 = vsyncpa [#allocation4], 1 }
 0x34a   :  { %641 = vsyncpa [#allocation4 + $0x1], 1 }

</bundles_post_ra>
